<compile_context>
chip_gen: v7x
topology: tpu7x:2x2x1
jax: 0.10.0
libtpu: 0.0.40
codegen_flags: <defaults>
</compile_context>

<pallas_src>
import math

import jax
import jax.numpy as jnp
from jax.experimental import pallas as pl
from jax.experimental.pallas import tpu as pltpu


# ---------------------------------------------------------------------------
# Small helpers
# ---------------------------------------------------------------------------
def _cdiv(a: int, b: int) -> int:
    return -(-a // b)


def _round_up(x: int, m: int) -> int:
    return ((x + m - 1) // m) * m


def _lane_pack_factor(d_model: int) -> int:
    """How many embedding rows to pack into one lane-dense output row."""
    for lanes in (256, 128):           # prefer 256 lanes: wider MXU N, fewer rows
        if lanes % d_model == 0:
            return lanes // d_model
    return 1                           # d_model already >= 128-ish or awkward; no packing


def _physical_vmem_bytes() -> int:
    try:
        return int(pltpu.get_tpu_info().vmem_capacity_bytes)
    except Exception:                  # conservative default = v7x per-core VMEM
        return 64 << 20


def _fixed_embedding_table(c_in: int, d_model: int) -> jnp.ndarray:
    """Deterministic sin/cos table identical to the PyTorch __init__."""
    assert d_model % 2 == 0, "d_model must be even (as in the reference impl)"
    position = jnp.arange(c_in, dtype=jnp.float32)[:, None]            # (c_in, 1)
    div_term = jnp.exp(
        jnp.arange(0, d_model, 2, dtype=jnp.float32)
        * (-(math.log(10000.0) / d_model))
    )                                                                   # (d_model//2,)
    w = jnp.zeros((c_in, d_model), dtype=jnp.float32)
    w = w.at[:, 0::2].set(jnp.sin(position * div_term))
    w = w.at[:, 1::2].set(jnp.cos(position * div_term))
    return w


# ---------------------------------------------------------------------------
# Kernel
# ---------------------------------------------------------------------------
def _packed_gather_kernel(idx_ref, w_ref, out_ref):
    # idx_ref: (tile_rows, G) int32       -- G flat row indices per packed row
    # w_ref:   (G*c_in, G*d_model) f32    -- block-diagonal packed table
    # out_ref: (tile_rows, G*d_model) f32 -- lane-dense packed output slab
    tile_rows, g_pack = idx_ref.shape
    gc_in = w_ref.shape[0]
    c_in = gc_in // g_pack

    # One-hot over the packed (block-diagonal) table rows.  Accumulate per-band
    # hits as booleans (logical OR) with a single int->f32 cast at the end:
    # G compares + (G-1) ORs instead of G float adds + G int->f32 converts.
    col = jax.lax.broadcasted_iota(jnp.int32, (tile_rows, gc_in), 1)
    hit = None
    for g in range(g_pack):
        # Band g selects table row idx[:, g] inside columns [g*c_in, (g+1)*c_in).
        target = idx_ref[:, g:g + 1] + g * c_in            # (tile_rows, 1)
        band_hit = col == target
        hit = band_hit if hit is None else jnp.logical_or(hit, band_hit)
    one_hot = hit.astype(jnp.float32)

    # Exact 0/1 f32 selector x f32 table -> bit-exact vs. jnp.take.
    # TODO(synk): on v5e, casting one_hot / w_packed to bf16 doubles MXU rate
    # and halves table traffic, at the cost of bf16-rounded outputs.
    out_ref[...] = jnp.dot(one_hot, w_ref[...], preferred_element_type=jnp.float32)


# ---------------------------------------------------------------------------
# Tiling plan (honest VMEM accounting, generation-aware)
# ---------------------------------------------------------------------------
def _plan_tiles(rows: int, gc_in: int, width: int, budget_bytes: int):
    per_row = (2 * width * 4      # output tile (double-buffered)
               + 2 * 128 * 4      # idx tile, lane-padded to 128 lanes (double-buffered)
               + gc_in * 4        # one-hot f32 intermediate
               + width * 4)       # matmul result staging / layout slack
    w_bytes = 2 * gc_in * width * 4   # packed table (default double-buffering charged)
    avail = max(budget_bytes - w_bytes, 8 * per_row)
    budget_rows = max(8, (avail // per_row) // 8 * 8)

    # Balance the grid: at least 2 steps when possible (keeps both v7x cores
    # busy) and a nearly-full last tile (no wasted tail stores/DMAs).
    min_steps = 2 if rows >= 16 else 1
    num_steps = max(_cdiv(rows, budget_rows), min_steps)
    tile_rows = _round_up(_cdiv(rows, num_steps), 8)
    rows_padded = tile_rows * num_steps
    per_step_bytes = per_row * tile_rows + w_bytes
    return tile_rows, rows_padded, num_steps, per_step_bytes


# ---------------------------------------------------------------------------
# Module wrapper (forward only; the table carries no gradients)
# ---------------------------------------------------------------------------
class FixedEmbedding:
    """JAX/Pallas port of the PyTorch FixedEmbedding module (forward pass)."""

    def __init__(self, c_in: int, d_model: int):
        assert d_model % 2 == 0, "d_model must be even (as in the reference impl)"
        self.c_in = c_in
        self.d_model = d_model
        self.w = _fixed_embedding_table(c_in, d_model)       # (c_in, d_model) f32

        self.g_pack = _lane_pack_factor(d_model)
        self.width = self.g_pack * d_model
        self.gc_in = self.g_pack * c_in

        # Block-diagonal packed table, built ONCE here (hoisted out of forward).
        if self.g_pack == 1:
            self.w_packed = self.w
        else:
            wp = jnp.zeros((self.gc_in, self.width), jnp.float32)
            for g in range(self.g_pack):
                wp = wp.at[g * c_in:(g + 1) * c_in,
                           g * d_model:(g + 1) * d_model].set(self.w)
            self.w_packed = wp

    def __call__(self, x: jnp.ndarray, *, force_pallas: bool = False) -> jnp.ndarray:
        """x: (batch, seq_len) integer indices -> (batch, seq_len, d_model) f32."""
        b, s = x.shape
        n = b * s
        # Out-of-range indices are clamped to [0, c_in) (PyTorch would raise);
        # this also prevents any cross-band selection in the packed one-hot.
        xi = jnp.clip(x.astype(jnp.int32), 0, self.c_in - 1)

        # Bypasses:
        #  * tiny n: the pallas_call is 100% fixed overhead -> plain gather.
        #  * large c_in: the block-diagonal one-hot costs O(tile_rows*G*c_in)
        #    VMEM/VPU; use XLA's gather until the DMA-gather kernel exists.
        #    TODO(synk): PrefetchScalarGridSpec per-row DMA gather for big c_in.
        small_n = (not force_pallas) and n < 2048
        big_table = self.gc_in > 2048
        if small_n or big_table:
            return jnp.take(self.w, xi, axis=0)
        return self._pallas_forward(xi, b, s, n)

    def _pallas_forward(self, xi, b, s, n):
        g, width, gc_in = self.g_pack, self.width, self.gc_in
        rows = _cdiv(n, g)

        phys = _physical_vmem_bytes()
        budget = min(phys // 4, 24 << 20)      # v5e/v6e: 24 MiB, v7x: 16 MiB
        tile_rows, rows_padded, num_steps, per_step = _plan_tiles(
            rows, gc_in, width, budget)
        vmem_limit = int(min(phys // 2, max(per_step + (8 << 20), 16 << 20)))

        flat = xi.reshape(-1)
        total = rows_padded * g
        if total > n:
            # Padded tail indices are 0 (select table row 0); they live strictly
            # at the flat tail and are sliced off after the unpacking reshape.
            flat = jnp.pad(flat, (0, total - n))
        idx2d = flat.reshape(rows_padded, g)
        # TODO(synk): deliver idx band-transposed (g, rows) + one in-kernel XLU
        # reshuffle to avoid the 128-lane padding of this (rows, g) block; its
        # padded footprint is charged to the VMEM budget above instead.

        out_packed = pl.pallas_call(
            _packed_gather_kernel,
            out_shape=jax.ShapeDtypeStruct((rows_padded, width), jnp.float32),
            grid=(num_steps,),
            in_specs=[
                pl.BlockSpec((tile_rows, g), lambda i: (i, 0)),
                # Constant index_map: the pipeline fetches this block once per
                # core and reuses it across grid steps.
                # TODO(synk): pipeline_mode=pl.Buffered(1) (or scratch staging)
                # would halve its VMEM; it is charged x2 in the budget instead.
                pl.BlockSpec((gc_in, width), lambda i: (0, 0)),
            ],
            out_specs=pl.BlockSpec((tile_rows, width), lambda i: (i, 0)),
            compiler_params=pltpu.CompilerParams(
                dimension_semantics=("parallel",),
                vmem_limit_bytes=vmem_limit,
            ),
        )(idx2d, self.w_packed)

        # Undo lane packing (row-major contiguous => free reshape), drop padding.
        out = out_packed.reshape(rows_padded * g, self.d_model)[:n]
        return out.reshape(b, s, self.d_model)


# ---------------------------------------------------------------------------
# Self-test
# ---------------------------------------------------------------------------
if __name__ == "__main__":
    c_in = 16      # table size (number of positions / channels)
    d_model = 32   # embedding dimension
    batch = 2
    seq_len = 8

    key = jax.random.PRNGKey(0)
    x = jax.random.randint(key, (batch, seq_len), 0, c_in, dtype=jnp.int32)

    emb = FixedEmbedding(c_in, d_model)
    ref = jnp.take(emb.w, x, axis=0)

    # Exercise the Pallas kernel (the auto path would bypass at this tiny n).
    out = jax.block_until_ready(emb(x, force_pallas=True))
    assert out.shape == (batch, seq_len, d_model)
    assert out.dtype == jnp.float32
    assert jnp.allclose(out, ref, atol=1e-6), "Pallas kernel mismatch vs reference gather"

    # Auto path (small-n bypass) must match as well.
    out_auto = jax.block_until_ready(emb(x))
    assert jnp.allclose(out_auto, ref, atol=1e-6)

    print("KERNEL_OK")
</pallas_src>

<mosaic_0001>
module attributes {stable_mosaic.version = 11 : i64} {
  func.func @_packed_gather_kernel(%arg0: i32, %arg1: memref<8x8xi32, #tpu.memory_space<vmem>>, %arg2: memref<128x256xf32, #tpu.memory_space<vmem>>, %arg3: memref<8x256xf32, #tpu.memory_space<vmem>>) attributes {dimension_semantics = [#tpu.dimension_semantics<parallel>], iteration_bounds = array<i64: 1>, scalar_prefetch = 0 : i64, scratch_operands = 0 : i64, tpu.core_type = #tpu.core_type<tc>, window_params = [{transform_indices = @transform_0, window_bounds = array<i64: 8, 8>}, {pipeline_mode = #tpu.pipeline_mode<synchronous>, transform_indices = @transform_1, window_bounds = array<i64: 128, 256>}, {transform_indices = @transform_2, window_bounds = array<i64: 8, 256>}]} {
    %0 = tpu.iota {dimensions = array<i32: 1>} : vector<8x128xi32>
    %c0 = arith.constant 0 : index
    %c0_0 = arith.constant 0 : index
    %1 = vector.load %arg1[%c0, %c0_0] : memref<8x8xi32, #tpu.memory_space<vmem>>, vector<8x1xi32>
    %c0_i32 = arith.constant 0 : i32
    %2 = vector.broadcast %c0_i32 : i32 to vector<8x1xi32>
    %3 = arith.addi %1, %2 : vector<8x1xi32>
    %4 = vector.broadcast %3 : vector<8x1xi32> to vector<8x128xi32>
    %5 = arith.cmpi eq, %0, %4 : vector<8x128xi32>
    %c0_1 = arith.constant 0 : index
    %c1 = arith.constant 1 : index
    %6 = vector.load %arg1[%c0_1, %c1] : memref<8x8xi32, #tpu.memory_space<vmem>>, vector<8x1xi32>
    %c16_i32 = arith.constant 16 : i32
    %7 = vector.broadcast %c16_i32 : i32 to vector<8x1xi32>
    %8 = arith.addi %6, %7 : vector<8x1xi32>
    %9 = vector.broadcast %8 : vector<8x1xi32> to vector<8x128xi32>
    %10 = arith.cmpi eq, %0, %9 : vector<8x128xi32>
    %11 = arith.ori %5, %10 : vector<8x128xi1>
    %c0_2 = arith.constant 0 : index
    %c2 = arith.constant 2 : index
    %12 = vector.load %arg1[%c0_2, %c2] : memref<8x8xi32, #tpu.memory_space<vmem>>, vector<8x1xi32>
    %c32_i32 = arith.constant 32 : i32
    %13 = vector.broadcast %c32_i32 : i32 to vector<8x1xi32>
    %14 = arith.addi %12, %13 : vector<8x1xi32>
    %15 = vector.broadcast %14 : vector<8x1xi32> to vector<8x128xi32>
    %16 = arith.cmpi eq, %0, %15 : vector<8x128xi32>
    %17 = arith.ori %11, %16 : vector<8x128xi1>
    %c0_3 = arith.constant 0 : index
    %c3 = arith.constant 3 : index
    %18 = vector.load %arg1[%c0_3, %c3] : memref<8x8xi32, #tpu.memory_space<vmem>>, vector<8x1xi32>
    %c48_i32 = arith.constant 48 : i32
    %19 = vector.broadcast %c48_i32 : i32 to vector<8x1xi32>
    %20 = arith.addi %18, %19 : vector<8x1xi32>
    %21 = vector.broadcast %20 : vector<8x1xi32> to vector<8x128xi32>
    %22 = arith.cmpi eq, %0, %21 : vector<8x128xi32>
    %23 = arith.ori %17, %22 : vector<8x128xi1>
    %c0_4 = arith.constant 0 : index
    %c4 = arith.constant 4 : index
    %24 = vector.load %arg1[%c0_4, %c4] : memref<8x8xi32, #tpu.memory_space<vmem>>, vector<8x1xi32>
    %c64_i32 = arith.constant 64 : i32
    %25 = vector.broadcast %c64_i32 : i32 to vector<8x1xi32>
    %26 = arith.addi %24, %25 : vector<8x1xi32>
    %27 = vector.broadcast %26 : vector<8x1xi32> to vector<8x128xi32>
    %28 = arith.cmpi eq, %0, %27 : vector<8x128xi32>
    %29 = arith.ori %23, %28 : vector<8x128xi1>
    %c0_5 = arith.constant 0 : index
    %c5 = arith.constant 5 : index
    %30 = vector.load %arg1[%c0_5, %c5] : memref<8x8xi32, #tpu.memory_space<vmem>>, vector<8x1xi32>
    %c80_i32 = arith.constant 80 : i32
    %31 = vector.broadcast %c80_i32 : i32 to vector<8x1xi32>
    %32 = arith.addi %30, %31 : vector<8x1xi32>
    %33 = vector.broadcast %32 : vector<8x1xi32> to vector<8x128xi32>
    %34 = arith.cmpi eq, %0, %33 : vector<8x128xi32>
    %35 = arith.ori %29, %34 : vector<8x128xi1>
    %c0_6 = arith.constant 0 : index
    %c6 = arith.constant 6 : index
    %36 = vector.load %arg1[%c0_6, %c6] : memref<8x8xi32, #tpu.memory_space<vmem>>, vector<8x1xi32>
    %c96_i32 = arith.constant 96 : i32
    %37 = vector.broadcast %c96_i32 : i32 to vector<8x1xi32>
    %38 = arith.addi %36, %37 : vector<8x1xi32>
    %39 = vector.broadcast %38 : vector<8x1xi32> to vector<8x128xi32>
    %40 = arith.cmpi eq, %0, %39 : vector<8x128xi32>
    %41 = arith.ori %35, %40 : vector<8x128xi1>
    %c0_7 = arith.constant 0 : index
    %c7 = arith.constant 7 : index
    %42 = vector.load %arg1[%c0_7, %c7] : memref<8x8xi32, #tpu.memory_space<vmem>>, vector<8x1xi32>
    %c112_i32 = arith.constant 112 : i32
    %43 = vector.broadcast %c112_i32 : i32 to vector<8x1xi32>
    %44 = arith.addi %42, %43 : vector<8x1xi32>
    %45 = vector.broadcast %44 : vector<8x1xi32> to vector<8x128xi32>
    %46 = arith.cmpi eq, %0, %45 : vector<8x128xi32>
    %47 = arith.ori %41, %46 : vector<8x128xi1>
    %48 = arith.extui %47 : vector<8x128xi1> to vector<8x128xi32>
    %49 = arith.sitofp %48 : vector<8x128xi32> to vector<8x128xf32>
    %c0_8 = arith.constant 0 : index
    %c0_9 = arith.constant 0 : index
    %50 = vector.load %arg2[%c0_8, %c0_9] : memref<128x256xf32, #tpu.memory_space<vmem>>, vector<128x256xf32>
    %cst = arith.constant dense<0.000000e+00> : vector<8x256xf32>
    %51 = tpu.matmul %49, %50, %cst {dimension_numbers = #tpu.dot_dimension_numbers<[1], [0], [0], [1], [0, 0, 1, 1], [], []>} : vector<8x128xf32>, vector<128x256xf32>, vector<8x256xf32> -> vector<8x256xf32>
    %c0_10 = arith.constant 0 : index
    %c0_11 = arith.constant 0 : index
    %52 = vector.load %arg3[%c0_10, %c0_11] : memref<8x256xf32, #tpu.memory_space<vmem>>, vector<8x256xf32>
    tpu.vector_store %arg3[%c0_10, %c0_11], %51 {strides = array<i32>} : memref<8x256xf32, #tpu.memory_space<vmem>>, vector<8x256xf32>,
    return
  }
  func.func @transform_0(%arg0: i32) -> (i32, i32) {
    %c0_i32 = arith.constant 0 : i32
    %c0_i32_0 = arith.constant 0 : i32
    return %arg0, %c0_i32 : i32, i32
  }
  func.func @transform_1(%arg0: i32) -> (i32, i32) {
    %c0_i32 = arith.constant 0 : i32
    %c0_i32_0 = arith.constant 0 : i32
    %c0_i32_1 = arith.constant 0 : i32
    return %c0_i32, %c0_i32_0 : i32, i32
  }
  func.func @transform_2(%arg0: i32) -> (i32, i32) {
    %c0_i32 = arith.constant 0 : i32
    %c0_i32_0 = arith.constant 0 : i32
    return %arg0, %c0_i32 : i32, i32
  }
}

</mosaic_0001>

<bundles_post_ra>
// kernel: tpu_custom_call.1
= control target key start
LH: loop header
LB: loop body
LE: loop exit
PB: predicated region body
PF: predicated region fallthrough
CT: control target
= control target key end

     0   :  { %7 = vsyncpa [#allocation3], 0  ;;  %s420_s0 = inlined_call_operand.hbm [shape: s32[8,8], index: 0, kind: input, shape index: {}]   ;;  %s421_s1 = inlined_call_operand.hbm [shape: f32[128,256], index: 1, kind: input, shape index: {}]   ;;  %s422_s2 = inlined_call_operand.hbm [shape: f32[8,256], index: 2, kind: output, shape index: {}]  }
   0x1   :  { %8 = vsyncpa [#allocation6], 0 }
   0x2   :  { %9 = vsyncpa [#allocation4], 0  ;;  %s338_s9 = smov [#allocation2]   ;;  %s339_s11 = smov [#allocation5]  }
   0x3   :  { %s16_s10 = sshll.u32 %s338_s9, 4  ;;  %s25_s12 = sshll.u32 %s339_s11, 4  ;;  %s17_s10 = int_to_ptr.vmem [resolvable:$true] %s16_s10  ;;  %s367_s12 = int_to_ptr.vmem [resolvable:$true] %s25_s12 }
   0x4   :  { %s266_s15 = scalar_lea.hbm %s420_s0, 128 }
   0x5   :  { %p267_p0 = scmp.ne.s32.totalorder %s420_s0, %s266_s15  ;;  %p270_p1 = scmp.lt.u32.totalorder %s266_s15, %s420_s0 }
   0x7   :  { %p272_p2 = pnand %p270_p1, %p267_p0 }
   0x9   :  { %275 = shalt.err (!%p272_p2)
}
   0xa   :  { %s276_s20 = scalar_lea.vmem %s17_s10, 128  ;;  %p281_p4 = scmp.lt.s32.totalorder %s17_s10, %s17_s10 }
   0xb   :  { %p277_p3 = scmp.ne.s32.totalorder %s17_s10, %s276_s20  ;;  %p282_p5 = scmp.lt.s32.totalorder %s276_s20, %s276_s20 }
   0xd   :  { %p283_p6 = por %p282_p5, %p281_p4 }
   0xf   :  { %p284_p7 = pnand %p283_p6, %p277_p3 }
  0x11   :  { %287 = shalt.err (!%p284_p7)
}
  0x12   :  { %19 = dma.hbm_to_vmem [thread:$0]  %s420_s0, 128, %s17_s10, [#allocation3]  }
  0x13   :  { %s288_s25 = scalar_lea.hbm %s421_s1, 4096 }
  0x14   :  { %p289_p8 = scmp.ne.s32.totalorder %s421_s1, %s288_s25  ;;  %p292_p9 = scmp.lt.u32.totalorder %s288_s25, %s421_s1 }
  0x16   :  { %p294_p10 = pnand %p292_p9, %p289_p8 }
  0x18   :  { %297 = shalt.err (!%p294_p10)
}
  0x19   :  { %s298_s30 = scalar_lea.vmem %s367_s12, 4096  ;;  %p303_p12 = scmp.lt.s32.totalorder %s367_s12, %s367_s12 }
  0x1a   :  { %p299_p11 = scmp.ne.s32.totalorder %s367_s12, %s298_s30  ;;  %p304_p13 = scmp.lt.s32.totalorder %s298_s30, %s298_s30 }
  0x1c   :  { %p305_p0 = por %p304_p13, %p303_p12 }
  0x1e   :  { %p306_p1 = pnand %p305_p0, %p299_p11 }
  0x20   :  { %309 = shalt.err (!%p306_p1)
}
  0x21   :  { %s340_s0 = smov 256   ;;  %s341_s3 = smov 16  }
  0x22   :  { %31 = dma.hbm_to_vmem [thread:$0]  %s421_s1, 4096, %s367_s12, [#allocation6], %s340_s0, %s340_s0, %s341_s3  }
  0x23   :  { %332 = dma.done.wait [#allocation3], 128  }
  0x24   :  { %333 = vsyncadd [#allocation3], 4294967168 }
  0x25   :  { %334 = dma.done.wait [#allocation6], 4096  }
  0x26   :  { %335 = vsyncadd [#allocation6], 4294963200  ;;  %v342_v0 = vmov 0   ;;  %v343_v1 = vmov 2   ;;  %v398_v2 = vld [vmem:[#allocation2] sm:$0xff]  ;;  %v90_v3 = vld [vmem:[#allocation5 + $0x8] sm:$0xff] }
  0x27   :  { %257 = vset.pattern.permute.xlu0 %v342_v0  ;;  %259 = vset.pattern.permute.xlu1 %v343_v1  ;;  %v92_v4 = vld [vmem:[#allocation5 + $0x18] sm:$0xff]  ;;  %v51_v5 = vadd.s32 32, %v398_v2  ;;  %v89_v6 = vld [vmem:[#allocation5] sm:$0xff]  ;;  %v91_v7 = vld [vmem:[#allocation5 + $0x10] sm:$0xff]  ;;  %v45_v8 = vadd.s32 16, %v398_v2  ;;  %v57_v18 = vadd.s32 48, %v398_v2 }
  0x28   :  { %42 = vperm.xlu0 %257, %v398_v2   ;;  %v211_v9 = vpack.c.bf16 %v92_v4, %v90_v3  ;;  %v94_v10 = vld [vmem:[#allocation5 + $0x28] sm:$0xff]  ;;  %v96_v11 = vld [vmem:[#allocation5 + $0x38] sm:$0xff]  ;;  %v93_v12 = vld [vmem:[#allocation5 + $0x20] sm:$0xff]  ;;  %v213_v13 = vpack.c.bf16 %v91_v7, %v89_v6  ;;  %v344_v19 = vmov 1   ;;  %v345_v24 = vmov 3   ;;  %s351_s1 = smov [#allocation7]  }
  0x29   :  { %53 = vperm.xlu1 %259, %v51_v5   ;;  %v215_v14 = vpack.c.bf16 %v96_v11, %v94_v10  ;;  %v95_v15 = vld [vmem:[#allocation5 + $0x30] sm:$0xff]  ;;  %v98_v16 = vld [vmem:[#allocation5 + $0x48] sm:$0xff]  ;;  %v100_v17 = vld [vmem:[#allocation5 + $0x58] sm:$0xff]  ;;  %v69_v25 = vadd.s32 80, %v398_v2  ;;  %v63_v28 = vadd.s32 64, %v398_v2  ;;  %v346_v30 = vmov 5  }
  0x2a   :  { %212 = vmatprep.subr.bf16.mxu0 %v211_v9  ;;  %v217_v20 = vpack.c.bf16 %v95_v15, %v93_v12  ;;  %v219_v21 = vpack.c.bf16 %v100_v17, %v98_v16  ;;  %v97_v22 = vld [vmem:[#allocation5 + $0x40] sm:$0xff]  ;;  %v99_v23 = vld [vmem:[#allocation5 + $0x50] sm:$0xff]  ;;  %v102_v26 = vld [vmem:[#allocation5 + $0x68] sm:$0xff]  ;;  %v347_v36 = vmov 4   ;;  %v75_v38 = vadd.s32 96, %v398_v2  ;;  %s200_s6 = sshll.u32 %s351_s1, 4  ;;  %s201_s6 = int_to_ptr.vmem [resolvable:$true] %s200_s6 }
  0x2b   :  { %214 = vmatpush1.bf16.msra.mxu0 %v213_v13  ;;  %v104_v27 = vld [vmem:[#allocation5 + $0x78] sm:$0xff]  ;;  %v221_v29 = vpack.c.bf16 %v99_v23, %v97_v22  ;;  %v101_v32 = vld [vmem:[#allocation5 + $0x60] sm:$0xff]  ;;  %v103_v33 = vld [vmem:[#allocation5 + $0x70] sm:$0xff]  ;;  %v348_v44 = vmov 7   ;;  %v349_v45 = vmov 6   ;;  %v81_v50 = vadd.s32 112, %v398_v2  ;;  %p315_p3 = scmp.lt.s32.totalorder %s201_s6, %s201_s6 }
  0x2c   :  { %258 = vset.pattern.permute.xlu0 %v344_v19  ;;  %216 = vmatprep.subr.bf16.mxu0 %v215_v14  ;;  %v223_v31 = vpack.c.bf16 %v104_v27, %v102_v26  ;;  %v106_v34 = vld [vmem:[#allocation5 + $0x88] sm:$0xff]  ;;  %v108_v35 = vld [vmem:[#allocation5 + $0x98] sm:$0xff]  ;;  %v225_v37 = vpack.c.bf16 %v103_v33, %v101_v32  ;;  %v105_v40 = vld [vmem:[#allocation5 + $0x80] sm:$0xff]  ;;  %v350_v60 = vmov 0.0   ;;  %v38_v3 = vlaneseq  ;;  %s310_s7 = scalar_lea.vmem %s201_s6, 256 }
  0x2d   :  { %47 = vperm.xlu0 %258, %v45_v8   ;;  %260 = vset.pattern.permute.xlu1 %v345_v24  ;;  %v227_v39 = vpack.c.bf16 %v108_v35, %v106_v34  ;;  %v107_v41 = vld [vmem:[#allocation5 + $0x90] sm:$0xff]  ;;  %v110_v42 = vld [vmem:[#allocation5 + $0xa8] sm:$0xff]  ;;  %v112_v43 = vld [vmem:[#allocation5 + $0xb8] sm:$0xff]  ;;  %p311_p2 = scmp.ne.s32.totalorder %s201_s6, %s310_s7  ;;  %p316_p4 = scmp.lt.s32.totalorder %s310_s7, %s310_s7 }
  0x2e   :  { %59 = vperm.xlu1 %260, %v57_v18   ;;  %v229_v46 = vpack.c.bf16 %v107_v41, %v105_v40  ;;  %v231_v47 = vpack.c.bf16 %v112_v43, %v110_v42  ;;  %v109_v48 = vld [vmem:[#allocation5 + $0xa0] sm:$0xff]  ;;  %v111_v49 = vld [vmem:[#allocation5 + $0xb0] sm:$0xff]  ;;  %v114_v51 = vld [vmem:[#allocation5 + $0xc8] sm:$0xff]  ;;  %185 = vmatprep.mubr.f32.mxu0 %v350_v60  ;;  %v39_v5 = vand.u32 127, %v38_v3 }
  0x2f   :  { %218 = vmatpush1.bf16.msra.mxu0 %v217_v20  ;;  %v116_v52 = vld [vmem:[#allocation5 + $0xd8] sm:$0xff]  ;;  %v233_v53 = vpack.c.bf16 %v111_v49, %v109_v48  ;;  %v113_v55 = vld [vmem:[#allocation5 + $0xc0] sm:$0xff]  ;;  %v115_v56 = vld [vmem:[#allocation5 + $0xd0] sm:$0xff]  ;;  %p317_p5 = por %p316_p4, %p315_p3 }
  0x30   :  { %220 = vmatprep.subr.bf16.mxu0 %v219_v21  ;;  %v235_v54 = vpack.c.bf16 %v116_v52, %v114_v51  ;;  %v118_v57 = vld [vmem:[#allocation5 + $0xe8] sm:$0xff]  ;;  %v120_v58 = vld [vmem:[#allocation5 + $0xf8] sm:$0xff]  ;;  %v237_v59 = vpack.c.bf16 %v115_v56, %v113_v55  ;;  %v117_v62 = vld [vmem:[#allocation5 + $0xe0] sm:$0xff] }
  0x31   :  { %262 = vset.pattern.permute.xlu0 %v346_v30  ;;  %v239_v61 = vpack.c.bf16 %v120_v58, %v118_v57  ;;  %v119_v63 = vld [vmem:[#allocation5 + $0xf0] sm:$0xff]  ;;  %p318_p6 = pnand %p317_p5, %p311_p2 }
  0x32   :  { %71 = vperm.xlu0 %262, %v69_v25   ;;  %261 = vset.pattern.permute.xlu1 %v347_v36  ;;  %v241_v0 = vpack.c.bf16 %v119_v63, %v117_v62 }
  0x33   :  { %65 = vperm.xlu1 %261, %v63_v28   ;;  %222 = vmatpush1.bf16.msra.mxu0 %v221_v29 }
  0x34   :  { %224 = vmatprep.subr.bf16.mxu0 %v223_v31 }
  0x36   :  { %265 = vset.pattern.permute.xlu0 %v348_v44 }
  0x37   :  { %263 = vset.pattern.permute.xlu1 %v349_v45  ;;  %226 = vmatpush1.bf16.msra.mxu0 %v225_v37 }
  0x38   :  { %77 = vperm.xlu1 %263, %v75_v38   ;;  %228 = vmatprep.subr.bf16.mxu0 %v227_v39 }
  0x3b   :  { %230 = vmatpush1.bf16.msra.mxu0 %v229_v46 }
  0x3c   :  { %264 = vset.pattern.permute.xlu1 %v348_v44  ;;  %232 = vmatprep.subr.bf16.mxu0 %v231_v47 }
  0x3d   :  { %83 = vperm.xlu1 %264, %v81_v50  }
  0x3f   :  { %234 = vmatpush1.bf16.msra.mxu0 %v233_v53 }
  0x40   :  { %236 = vmatprep.subr.bf16.mxu0 %v235_v54 }
  0x43   :  { %238 = vmatpush1.bf16.msra.mxu0 %v237_v59 }
  0x44   :  { %240 = vmatprep.subr.bf16.mxu0 %v239_v61 }
  0x47   :  { %242 = vmatpush1.bf16.msra.mxu0 %v241_v0 }
  0xa7   :  { %v43_v1 = vpop.permute.xlu0 %42 }
  0xa8   :  { %v54_v2 = vpop.permute.xlu1 %53  ;;  %vm44_vm0 = vcmp.eq.s32.totalorder %v39_v5, %v43_v1 }
  0xa9   :  { %vm55_vm3 = vcmp.eq.s32.totalorder %v39_v5, %v54_v2 }
  0xac   :  { %v48_v4 = vpop.permute.xlu0 %47 }
  0xad   :  { %v60_v6 = vpop.permute.xlu1 %59  ;;  %vm49_vm1 = vcmp.eq.s32.totalorder %v39_v5, %v48_v4 }
  0xae   :  { %vm50_vm2 = vmor %vm44_vm0, %vm49_vm1  ;;  %vm61_vm5 = vcmp.eq.s32.totalorder %v39_v5, %v60_v6 }
  0xaf   :  { %vm56_vm4 = vmor %vm50_vm2, %vm55_vm3 }
  0xb0   :  { %vm62_vm7 = vmor %vm56_vm4, %vm61_vm5 }
  0xb1   :  { %v72_v8 = vpop.permute.xlu0 %71 }
  0xb2   :  { %v66_v7 = vpop.permute.xlu1 %65  ;;  %vm73_vm9 = vcmp.eq.s32.totalorder %v39_v5, %v72_v8 }
  0xb3   :  { %vm67_vm6 = vcmp.eq.s32.totalorder %v39_v5, %v66_v7 }
  0xb4   :  { %vm68_vm8 = vmor %vm62_vm7, %vm67_vm6 }
  0xb5   :  { %vm74_vm11 = vmor %vm68_vm8, %vm73_vm9 }
  0xb7   :  { %v78_v9 = vpop.permute.xlu1 %77 }
  0xb8   :  { %vm79_vm10 = vcmp.eq.s32.totalorder %v39_v5, %v78_v9 }
  0xb9   :  { %vm80_vm12 = vmor %vm74_vm11, %vm79_vm10 }
  0xbc   :  { %v84_v10 = vpop.permute.xlu1 %83 }
  0xbd   :  { %vm85_vm13 = vcmp.eq.s32.totalorder %v39_v5, %v84_v10 }
  0xbe   :  { %vm86_vm14 = vmor %vm80_vm12, %vm85_vm13 }
  0xbf   :  { %v210_v11 = vsel %vm86_vm14, 1.0, %v350_v60 }
  0xc0   :  { %186 = vmatmul.mubr.f32.vlgmr.msra.gmra.mrb[0].mxu0 %v210_v11 }
 0x193   :  { %v187_v12 = vpop.f32.mrb[0].mxu0 }
 0x194   :  { %192 = vst [vmem:[#allocation7] sm:$0xff] %v187_v12  ;;  %v189_v13 = vpop.f32.mrb[1].mxu0 }
 0x195   :  { %193 = vst [vmem:[#allocation7 + $0x8] sm:$0xff] %v189_v13 }
 0x196   :  { %321 = shalt.err (!%p318_p6)
}
 0x197   :  { %s322_s10 = scalar_lea.hbm %s422_s2, 256 }
 0x198   :  { %p323_p7 = scmp.ne.s32.totalorder %s422_s2, %s322_s10  ;;  %p326_p8 = scmp.lt.u32.totalorder %s322_s10, %s422_s2 }
 0x19a   :  { %p328_p9 = pnand %p326_p8, %p323_p7 }
 0x19c   :  { %331 = shalt.err (!%p328_p9)
}
 0x19d   :  { %203 = dma.vmem_to_hbm [thread:$0]  %s201_s6, 256, %s422_s2, [#allocation4]  }
 0x19e   :  { %336 = dma.done.wait [#allocation4], 256  }
 0x19f   :  { %337 = vsyncadd [#allocation4], 4294967040 }
 0x1a0   :  { %207 = vsyncpa [#allocation3], 1 }
 0x1a1   :  { %208 = vsyncpa [#allocation6], 1 }
 0x1a2   :  { %209 = vsyncpa [#allocation4], 1 }

</bundles_post_ra>
